<compile_context>
chip_gen: v7x
topology: tpu7x:2x2x1
jax: 0.10.0
libtpu: 0.0.40
codegen_flags: <defaults>
</compile_context>

<pallas_src>
import math

import jax
import jax.numpy as jnp
from jax.experimental import pallas as pl
from jax.experimental.pallas import tpu as pltpu


# Below this size the fixed pallas_call launch / dispatch cost dominates, so the
# identity is returned directly (the output *is* the input, exactly like the
# PyTorch op returning the same tensor object).
_FAST_PATH_MAX_BYTES = 1 << 20          # 1 MiB

# Chunking of the HBM->HBM copy: a few outstanding DMAs give the DMA engines
# concurrency on large tensors; small tensors use a single descriptor.
_MAX_DMA_CHUNKS = 4
_MIN_CHUNK_BYTES = 1 << 20              # don't split below ~1 MiB per chunk


def _make_identity_dma_kernel(chunk_bounds):
    """Kernel factory: copy `x` to `o` with one HBM->HBM DMA per (static) chunk."""

    def kernel(x_hbm, o_hbm, sem):
        copies = []
        for i, (start, size) in enumerate(chunk_bounds):
            cp = pltpu.make_async_copy(
                x_hbm.at[pl.ds(start, size)],
                o_hbm.at[pl.ds(start, size)],
                sem.at[i],
            )
            cp.start()
            copies.append(cp)
        for cp in copies:
            cp.wait()

    return kernel


def generator_forward(x, *, force_pallas=False):
    """Pallas implementation of Generator.forward: identity."""
    total = math.prod(x.shape) if x.shape else 1
    itemsize = jnp.dtype(x.dtype).itemsize
    total_bytes = total * itemsize

    # Degenerate shapes (empty / 0-d): nothing to copy.
    if total == 0 or x.ndim == 0:
        return x
    # Small-tensor fast path: skip the kernel entirely (pure identity).
    if not force_pallas and total_bytes <= _FAST_PATH_MAX_BYTES:
        return x

    # Split the leading dim into a few near-equal, statically-known chunks so
    # several DMAs are in flight at once for large tensors.
    # TODO(synk): chunk along a later dim when shape[0] == 1 for huge tensors.
    dim0 = x.shape[0]
    n_chunks = max(1, min(_MAX_DMA_CHUNKS, dim0, total_bytes // _MIN_CHUNK_BYTES))
    base, rem = divmod(dim0, n_chunks)
    chunk_bounds = []
    start = 0
    for i in range(n_chunks):
        size = base + (1 if i < rem else 0)
        chunk_bounds.append((start, size))
        start += size

    return pl.pallas_call(
        _make_identity_dma_kernel(tuple(chunk_bounds)),
        out_shape=jax.ShapeDtypeStruct(x.shape, x.dtype),
        in_specs=[pl.BlockSpec(memory_space=pl.ANY)],
        out_specs=pl.BlockSpec(memory_space=pl.ANY),
        scratch_shapes=[pltpu.SemaphoreType.DMA((n_chunks,))],
        cost_estimate=pl.CostEstimate(
            flops=0, transcendentals=0, bytes_accessed=2 * total_bytes),
    )(x)


if __name__ == "__main__":
    key = jax.random.PRNGKey(0)
    # Small NCHW input consistent with a generator-style module.
    x = jax.random.normal(key, (2, 4, 16, 16), dtype=jnp.float32)

    # Exercise the Pallas HBM->HBM DMA kernel explicitly (the default path
    # would just return x for a tensor this small).
    y = generator_forward(x, force_pallas=True)
    y = jax.block_until_ready(y)

    assert y.shape == x.shape
    assert y.dtype == x.dtype
    assert bool(jnp.array_equal(y, x)), "identity kernel mismatch"

    # Default (fast-path) behavior: pure identity, no kernel launched.
    y_fast = jax.block_until_ready(generator_forward(x))
    assert bool(jnp.array_equal(y_fast, x))

    print("KERNEL_OK")
</pallas_src>

<mosaic_0001>
module attributes {stable_mosaic.version = 11 : i64} {
  func.func @kernel(%arg0: memref<2x4x16x16xf32, #tpu.memory_space<any>>, %arg1: memref<2x4x16x16xf32, #tpu.memory_space<any>>, %arg2: memref<1x!tpu.dma_semaphore, #tpu.memory_space<semaphore_mem>>) attributes {dimension_semantics = [], scalar_prefetch = 0 : i64, scratch_operands = 1 : i64, tpu.core_type = #tpu.core_type<tc>} {
    %c0_i32 = arith.constant 0 : i32
    %c0_i32_0 = arith.constant 0 : i32
    %c0_i32_1 = arith.constant 0 : i32
    %c0_i32_2 = arith.constant 0 : i32
    %c0_i32_3 = arith.constant 0 : i32
    %0 = tpu.memref_slice %arg0[%c0_i32_0, %c0_i32_1, %c0_i32_2, %c0_i32_3] : memref<2x4x16x16xf32, #tpu.memory_space<any>> -> memref<2x4x16x16xf32, #tpu.memory_space<any>>
    %c0_i32_4 = arith.constant 0 : i32
    %c0_i32_5 = arith.constant 0 : i32
    %c0_i32_6 = arith.constant 0 : i32
    %c0_i32_7 = arith.constant 0 : i32
    %1 = tpu.memref_slice %arg1[%c0_i32_4, %c0_i32_5, %c0_i32_6, %c0_i32_7] : memref<2x4x16x16xf32, #tpu.memory_space<any>> -> memref<2x4x16x16xf32, #tpu.memory_space<any>>
    %2 = tpu.memref_slice %arg2[%c0_i32] : memref<1x!tpu.dma_semaphore, #tpu.memory_space<semaphore_mem>> -> memref<1x!tpu.dma_semaphore, #tpu.memory_space<semaphore_mem>>
    %3 = tpu.memref_squeeze %2 : memref<1x!tpu.dma_semaphore, #tpu.memory_space<semaphore_mem>> -> memref<!tpu.dma_semaphore, #tpu.memory_space<semaphore_mem>>
    tpu.enqueue_dma source(%0 : memref<2x4x16x16xf32, #tpu.memory_space<any>>) target(%1 : memref<2x4x16x16xf32, #tpu.memory_space<any>>) target_semaphore(%3 : memref<!tpu.dma_semaphore, #tpu.memory_space<semaphore_mem>>)
    %c0_i32_8 = arith.constant 0 : i32
    %c0_i32_9 = arith.constant 0 : i32
    %c0_i32_10 = arith.constant 0 : i32
    %c0_i32_11 = arith.constant 0 : i32
    %c0_i32_12 = arith.constant 0 : i32
    %4 = tpu.memref_slice %arg0[%c0_i32_9, %c0_i32_10, %c0_i32_11, %c0_i32_12] : memref<2x4x16x16xf32, #tpu.memory_space<any>> -> memref<2x4x16x16xf32, #tpu.memory_space<any>>
    %c0_i32_13 = arith.constant 0 : i32
    %c0_i32_14 = arith.constant 0 : i32
    %c0_i32_15 = arith.constant 0 : i32
    %c0_i32_16 = arith.constant 0 : i32
    %5 = tpu.memref_slice %arg1[%c0_i32_13, %c0_i32_14, %c0_i32_15, %c0_i32_16] : memref<2x4x16x16xf32, #tpu.memory_space<any>> -> memref<2x4x16x16xf32, #tpu.memory_space<any>>
    %6 = tpu.memref_slice %arg2[%c0_i32_8] : memref<1x!tpu.dma_semaphore, #tpu.memory_space<semaphore_mem>> -> memref<1x!tpu.dma_semaphore, #tpu.memory_space<semaphore_mem>>
    %7 = tpu.memref_squeeze %6 : memref<1x!tpu.dma_semaphore, #tpu.memory_space<semaphore_mem>> -> memref<!tpu.dma_semaphore, #tpu.memory_space<semaphore_mem>>
    tpu.wait_dma2 semaphore(%7 : memref<!tpu.dma_semaphore, #tpu.memory_space<semaphore_mem>>) src(%4 : memref<2x4x16x16xf32, #tpu.memory_space<any>>) dst(%5 : memref<2x4x16x16xf32, #tpu.memory_space<any>>)
    return
  }
}

</mosaic_0001>

<bundles_post_ra>
// kernel: tpu_custom_call.1
= control target key start
LH: loop header
LB: loop body
LE: loop exit
PB: predicated region body
PF: predicated region fallthrough
CT: control target
= control target key end

     0   :  { %s36_s6 = smov [#allocation2]   ;;  %s37_s7 = smov [#allocation3]   ;;  %s55_s0 = inlined_call_operand.hbm [shape: f32[2,4,16,16], index: 0, kind: input, shape index: {}]   ;;  %s56_s1 = inlined_call_operand.hbm [shape: f32[2,4,16,16], index: 1, kind: output, shape index: {}]  }
   0x1   :  { %s38_s8 = smov 0  }
   0x2   :  { %18 = dma.general %s55_s0, 2048, %s56_s1, %s36_s6, %s37_s7, [#allocation4], %s38_s8, 0  }
   0x3   :  { %34 = dma.done.wait [#allocation2], 2048 }
   0x4   :  { %35 = vsyncadd [#allocation2], 4294965248 }
   0x5   :  { %24 = vsyncmov [#allocation2] }
   0x8   :  { %s25_s13 = vpop.sfrf %24 }
   0x9   :  { %p30_p0 = scmp.ne.s32.totalorder %s25_s13, 0 }
   0xb   :  { %29 = shalt.err (%p30_p0)  }

</bundles_post_ra>
